<compile_context>
chip_gen: v7x
topology: tpu7x:2x2x1
jax: 0.10.0
libtpu: 0.0.40
codegen_flags: <defaults>
</compile_context>

<pallas_src>
import numpy as np
import jax
import jax.numpy as jnp
from jax import lax
from jax.experimental import pallas as pl
from jax.experimental.pallas import tpu as pltpu

KSIZE = 5
HALO = KSIZE - 1  # 4


def compute_coefficient_sus(F_x, F_y, gamma, delta_xy):
    """Same arithmetic as the PyTorch helper; returns a (5, 5) numpy stencil."""
    p_delta_lr = F_x * delta_xy * 0.5 / gamma
    p_delta_ud = F_y * delta_xy * 0.5 / gamma
    a_u = max(p_delta_lr, 0)
    a_v = max(p_delta_ud, 0)
    a_P = a_u + a_v
    a_W = 2 * a_u
    a_S = 2 * a_v
    a_WW = a_u
    a_SS = a_v
    derivative_filter = np.array(
        [[0, 0, -a_SS, 0, 0],
         [0, 0, a_S, 0, 0],
         [-a_WW, a_W, -a_P, 0, 0],
         [0, 0, 0, 0, 0],
         [0, 0, 0, 0, 0]],
        dtype=np.float32,
    )
    return derivative_filter


def _make_sus_kernel(cols):
    """Build the conv kernel with the nonzero stencil taps baked in.

    cols: tuple of (dj, ((di, coeff), ...)) with Python-float coeff != 0,
    grouped by stencil column so each lane shift is applied exactly once.
    """

    def kernel(x_ref, o_ref):
        # x_ref: (NB, H, W) f32 VMEM, o_ref: (NB, H-4, W-4) f32 VMEM.
        nb, ho, wo = o_ref.shape
        bands = {}   # di -> (NB, HO, W) row band, loaded once and reused
        acc = None
        for dj, col_taps in cols:
            # Vertical (sublane) combination at full width W ...
            col = None
            for di, coeff in col_taps:
                if di not in bands:
                    # Static sublane-offset window read straight from the ref
                    # (no full-tile materialization -> less vreg pressure).
                    bands[di] = x_ref[:, di:di + ho, :]
                term = coeff * bands[di]
                col = term if col is None else col + term
            # ... then a single static lane-offset slice per stencil column.
            shifted = col[:, :, dj:dj + wo]
            acc = shifted if acc is None else acc + shifted
        if acc is None:  # degenerate all-zero stencil (F_x <= 0 and F_y <= 0)
            acc = jnp.zeros((nb, ho, wo), jnp.float32)
        o_ref[...] = acc.astype(o_ref.dtype)

    return kernel


def _pick_batch_block(n, h, w, target_bytes=2 << 20):
    """Images per grid step: large enough to amortize per-step pipeline
    overhead, small enough to stay far inside every generation's VMEM budget,
    and (when N > 1) leaving >= 2 grid steps so both v7x TensorCores get work.
    Chosen as an exact divisor of N so no partial blocks are needed."""
    per_image = h * w * 4
    nb_cap = max(1, target_bytes // per_image)
    if n > 1:
        nb_cap = min(nb_cap, max(1, n // 2))
    nb = 1
    for d in range(1, min(n, nb_cap) + 1):
        if n % d == 0:
            nb = d
    return nb


class Conv2dDerivativeSUS:
    """JAX / Pallas-TPU equivalent of the PyTorch module (forward only)."""

    def __init__(self, F_x, F_y, gamma, delta_xy):
        filt = compute_coefficient_sus(F_x, F_y, gamma, delta_xy)  # (5, 5)
        self.weight = jnp.asarray(filt)  # kept only for the reference check
        # Collect the nonzero taps, grouped by stencil column (lane offset dj).
        cols = {}
        for di in range(KSIZE):
            for dj in range(KSIZE):
                c = float(filt[di, dj])
                if c != 0.0:
                    cols.setdefault(dj, []).append((di, c))
        self._cols = tuple((dj, tuple(taps)) for dj, taps in sorted(cols.items()))

    def __call__(self, x):
        # x: (N, 1, H, W) float32, NCHW single channel, like the PyTorch module.
        n, c, h, w = x.shape
        assert c == 1, "Conv2dDerivativeSUS expects a single input channel"
        ho, wo = h - HALO, w - HALO

        nb = _pick_batch_block(n, h, w)
        grid = (n // nb,)

        # Double-buffered in+out blocks plus headroom; capped so the request is
        # valid on every generation (v5e 16 MiB default scoped, v7x 64 MiB phys).
        block_bytes = nb * (h * w + ho * wo) * 4
        vmem_limit = int(min(32 << 20, max(16 << 20, 4 * block_bytes)))

        # TODO(synk): for PDE grids too large for a full-image block (e.g. 2k^2
        # f32 on v7x's 64 MiB VMEM), halo-tile H/W with element-offset input
        # blocks instead of one image per step.
        # TODO(synk): optionally write a width-padded (lane-dense) output and
        # crop in XLA; skipped here pending verified pltpu.roll wrap semantics
        # for non-128-multiple widths on the target toolchain.
        out = pl.pallas_call(
            _make_sus_kernel(self._cols),
            out_shape=jax.ShapeDtypeStruct((n, 1, ho, wo), jnp.float32),
            grid_spec=pltpu.PrefetchScalarGridSpec(
                num_scalar_prefetch=0,
                grid=grid,
                in_specs=[
                    pl.BlockSpec(
                        (nb, pl.Squeezed(), h, w),
                        lambda b: (b, 0, 0, 0),
                    ),
                ],
                out_specs=pl.BlockSpec(
                    (nb, pl.Squeezed(), ho, wo),
                    lambda b: (b, 0, 0, 0),
                ),
            ),
            compiler_params=pltpu.CompilerParams(
                dimension_semantics=("parallel",),
                vmem_limit_bytes=vmem_limit,
            ),
        )(x)
        return out


def _reference_conv(x, w):
    """Pure-JAX reference (valid cross-correlation) for the correctness check."""
    kernel = w[None, None, :, :]  # OIHW
    return lax.conv_general_dilated(
        x, kernel, window_strides=(1, 1), padding="VALID",
        dimension_numbers=("NCHW", "OIHW", "NCHW"),
    )


if __name__ == "__main__":
    # Deterministic parameters for the stencil (synthetic, in-script).
    F_x, F_y, gamma, delta_xy = 10.0, 10.0, 0.1, 0.01

    mod = Conv2dDerivativeSUS(F_x, F_y, gamma, delta_xy)

    key = jax.random.PRNGKey(0)
    x = jax.random.normal(key, (2, 1, 16, 16), dtype=jnp.float32)

    y = jax.block_until_ready(mod(x))

    # Sanity-check against the plain-JAX convolution reference.
    y_ref = jax.block_until_ready(_reference_conv(x, mod.weight))
    assert y.shape == (2, 1, 12, 12)
    np.testing.assert_allclose(np.asarray(y), np.asarray(y_ref), rtol=1e-5, atol=1e-5)

    print("KERNEL_OK")
</pallas_src>

<mosaic_0001>
module attributes {stable_mosaic.version = 11 : i64} {
  func.func @kernel(%arg0: i32, %arg1: memref<1x1x16x16xf32, #tpu.memory_space<vmem>>, %arg2: memref<1x1x12x12xf32, #tpu.memory_space<vmem>>) attributes {dimension_semantics = [#tpu.dimension_semantics<parallel>], iteration_bounds = array<i64: 2>, scalar_prefetch = 0 : i64, scratch_operands = 0 : i64, tpu.core_type = #tpu.core_type<tc>, window_params = [{transform_indices = @transform_0, window_bounds = array<i64: 1, 1, 16, 16>}, {transform_indices = @transform_1, window_bounds = array<i64: 1, 1, 12, 12>}]} {
    %c0 = arith.constant 0 : index
    %c0_0 = arith.constant 0 : index
    %c2 = arith.constant 2 : index
    %c0_1 = arith.constant 0 : index
    %0 = vector.load %arg1[%c0, %c0_0, %c2, %c0_1] : memref<1x1x16x16xf32, #tpu.memory_space<vmem>>, vector<1x1x12x16xf32>
    %1 = vector.shape_cast %0 : vector<1x1x12x16xf32> to vector<1x12x16xf32>
    %cst = arith.constant -5.000000e-01 : f32
    %2 = vector.broadcast %cst : f32 to vector<1x12x16xf32>
    %3 = arith.mulf %2, %1 : vector<1x12x16xf32>
    %4 = vector.extract_strided_slice %3 {offsets = [0, 0, 0], sizes = [1, 12, 12], strides = [1, 1, 1]} : vector<1x12x16xf32> to vector<1x12x12xf32>
    %cst_2 = arith.constant 1.000000e+00 : f32
    %5 = vector.broadcast %cst_2 : f32 to vector<1x12x16xf32>
    %6 = arith.mulf %5, %1 : vector<1x12x16xf32>
    %7 = vector.extract_strided_slice %6 {offsets = [0, 0, 1], sizes = [1, 12, 12], strides = [1, 1, 1]} : vector<1x12x16xf32> to vector<1x12x12xf32>
    %8 = arith.addf %4, %7 : vector<1x12x12xf32>
    %c0_3 = arith.constant 0 : index
    %c0_4 = arith.constant 0 : index
    %c0_5 = arith.constant 0 : index
    %c0_6 = arith.constant 0 : index
    %9 = vector.load %arg1[%c0_3, %c0_4, %c0_5, %c0_6] : memref<1x1x16x16xf32, #tpu.memory_space<vmem>>, vector<1x1x12x16xf32>
    %10 = vector.shape_cast %9 : vector<1x1x12x16xf32> to vector<1x12x16xf32>
    %cst_7 = arith.constant -5.000000e-01 : f32
    %11 = vector.broadcast %cst_7 : f32 to vector<1x12x16xf32>
    %12 = arith.mulf %11, %10 : vector<1x12x16xf32>
    %c0_8 = arith.constant 0 : index
    %c0_9 = arith.constant 0 : index
    %c1 = arith.constant 1 : index
    %c0_10 = arith.constant 0 : index
    %13 = vector.load %arg1[%c0_8, %c0_9, %c1, %c0_10] : memref<1x1x16x16xf32, #tpu.memory_space<vmem>>, vector<1x1x12x16xf32>
    %14 = vector.shape_cast %13 : vector<1x1x12x16xf32> to vector<1x12x16xf32>
    %cst_11 = arith.constant 1.000000e+00 : f32
    %15 = vector.broadcast %cst_11 : f32 to vector<1x12x16xf32>
    %16 = arith.mulf %15, %14 : vector<1x12x16xf32>
    %17 = arith.addf %12, %16 : vector<1x12x16xf32>
    %cst_12 = arith.constant -1.000000e+00 : f32
    %18 = vector.broadcast %cst_12 : f32 to vector<1x12x16xf32>
    %19 = arith.mulf %18, %1 : vector<1x12x16xf32>
    %20 = arith.addf %17, %19 : vector<1x12x16xf32>
    %21 = vector.extract_strided_slice %20 {offsets = [0, 0, 2], sizes = [1, 12, 12], strides = [1, 1, 1]} : vector<1x12x16xf32> to vector<1x12x12xf32>
    %22 = arith.addf %8, %21 : vector<1x12x12xf32>
    %c0_13 = arith.constant 0 : index
    %c0_14 = arith.constant 0 : index
    %c0_15 = arith.constant 0 : index
    %c0_16 = arith.constant 0 : index
    %23 = vector.load %arg2[%c0_13, %c0_14, %c0_15, %c0_16] : memref<1x1x12x12xf32, #tpu.memory_space<vmem>>, vector<1x1x12x12xf32>
    %24 = vector.shape_cast %23 : vector<1x1x12x12xf32> to vector<1x12x12xf32>
    %25 = vector.shape_cast %22 : vector<1x12x12xf32> to vector<1x1x12x12xf32>
    tpu.vector_store %arg2[%c0_13, %c0_14, %c0_15, %c0_16], %25 {strides = array<i32>} : memref<1x1x12x12xf32, #tpu.memory_space<vmem>>, vector<1x1x12x12xf32>,
    return
  }
  func.func @transform_0(%arg0: i32) -> (i32, i32, i32, i32) {
    %c0_i32 = arith.constant 0 : i32
    %c0_i32_0 = arith.constant 0 : i32
    %c0_i32_1 = arith.constant 0 : i32
    %c0_i32_2 = arith.constant 0 : i32
    return %arg0, %c0_i32, %c0_i32_0, %c0_i32_1 : i32, i32, i32, i32
  }
  func.func @transform_1(%arg0: i32) -> (i32, i32, i32, i32) {
    %c0_i32 = arith.constant 0 : i32
    %c0_i32_0 = arith.constant 0 : i32
    %c0_i32_1 = arith.constant 0 : i32
    %c0_i32_2 = arith.constant 0 : i32
    return %arg0, %c0_i32, %c0_i32_0, %c0_i32_1 : i32, i32, i32, i32
  }
}

</mosaic_0001>

<bundles_post_ra>
// kernel: tpu_custom_call.1
= control target key start
LH: loop header
LB: loop body
LE: loop exit
PB: predicated region body
PF: predicated region fallthrough
CT: control target
= control target key end

     0   :  { %6 = vsyncpa [#allocation3], 0  ;;  %s490_s0 = inlined_call_operand.hbm [shape: f32[2,1,16,16], index: 0, kind: input, shape index: {}]   ;;  %s491_s1 = inlined_call_operand.vmem [shape: f32[2,1,12,12], index: 1, kind: output, shape index: {}]  }
   0x1   :  { %8 = vsyncpa [#allocation3 + $0x1], 0  ;;  %s382_s6 = smov 0   ;;  %s384_s7 = smov 0  }
   0x2   :  { %s386_s8 = smov 0   ;;  %s388_s9 = smov 0  }
   0x3 LB: > { %s401_s10 = sadd.s32 4294967295, %s365_s9   ;;  %s404_s11 = sadd.s32 1, %s365_s9   ;;  %s365_s9 = sphi %s388_s9, %s498_s9   ;;  %s361_s8 = sphi %s386_s8, %s497_s8   ;;  %s357_s7 = sphi %s384_s7, %s496_s7   ;;  %s353_s6 = sphi %s382_s6, %s495_s6  }
   0x4   : > { %s18_s12 = ssub.s32 %s365_s9, %s404_s11  ;;  %s21_s13 = sadd.s32 1, %s361_s8 }
   0x5   : > { %p19_p0 = scmp.eq.s32.totalorder %s18_s12, 0  ;;  %p28_p1 = scmp.ne.s32.totalorder %s361_s8, %s357_s7 }
   0x6   : > { %p29_p2 = scmp.eq.s32.totalorder %s365_s9, 0  ;;  %p34_p3 = scmp.ne.s32.totalorder %s357_s7, %s353_s6 }
   0x7   : > { %s414_s14 = scalar_select %p19_p0, %s361_s8, %s21_s13  }
   0x8   : > { %p30_p4 = por %p29_p2, %p28_p1  ;;  %p35_p5 = scmp.eq.s32.totalorder %s401_s10, 0 }
   0x9   : > { %p264_p6 = scmp.lt.s32.totalorder %s365_s9, 2  ;;  %s84_s16 = sand.u32 1, %s361_s8  }
   0xa   : > { %p418_p7 = por %p35_p5, %p34_p3  ;;  %s247_s17 = sshll.u32 %s84_s16, 4 }
   0xb   : > { %s256_s18 = sshll.u32 %s365_s9, 8  ;;  %s88_s22 = scalar_lea.vmem [#allocation2], %s247_s17 }
   0xc   : > { %s427_s21 = scalar_lea.hbm %s490_s0, %s256_s18  ;;  %s95_s23 = sshll.u32 %s88_s22, 4  ;;  %s429_s23 = int_to_ptr.vmem [resolvable:$true] %s95_s23 }
   0xd   : > { %p431_p8 = pnand %p264_p6, %p30_p4  ;;  %s436_s25 = scalar_lea.sflag [#allocation3], %s84_s16 }
   0xe   : > { %s301_s26 = scalar_lea.hbm %s427_s21, 256  ;;  %s306_s29 = scalar_lea.hbm %s490_s0, 512 }
   0xf   : > { %p302_p10 = scmp.ne.s32.totalorder %s427_s21, %s301_s26  ;;  %p303_p11 = pneg %p431_p8 }
  0x10   : > { %p307_p0 = scmp.lt.u32.totalorder %s427_s21, %s490_s0  ;;  %p308_p1 = scmp.lt.u32.totalorder %s306_s29, %s301_s26 }
  0x11   : > { %p304_p12 = pnand %p303_p11, %p302_p10  ;;  %p310_p3 = scmp.lt.u32.totalorder %s301_s26, %s427_s21 }
  0x12   : > { %p309_p2 = por %p308_p1, %p307_p0 }
  0x13   : > { %p305_p13 = pneg %p304_p12 }
  0x14   : > { %p311_p4 = por %p310_p3, %p309_p2 }
  0x16   : > { %p312_p5 = pnand %p311_p4, %p305_p13 }
  0x18   : > { %315 = shalt.err (!%p312_p5)
}
  0x19   : > { %s316_s3 = scalar_lea.vmem %s429_s23, 256  ;;  %s367_s4 = smov [#allocation2]  }
  0x1a   : > { %p317_p6 = scmp.ne.s32.totalorder %s429_s23, %s316_s3  ;;  %s321_s5 = sshll.u32 %s367_s4, 4  ;;  %s322_s5 = int_to_ptr.vmem [resolvable:$false] %s321_s5 }
  0x1b   : > { %s323_s6 = scalar_lea.vmem %s322_s5, 512  ;;  %p324_p9 = scmp.lt.s32.totalorder %s429_s23, %s322_s5 }
  0x1c   : > { %p319_p10 = pnand %p317_p6, %p303_p11  ;;  %p325_p0 = scmp.lt.s32.totalorder %s323_s6, %s316_s3 }
  0x1e   : > { %p320_p12 = pneg %p319_p10  ;;  %p326_p1 = por %p325_p0, %p324_p9 }
  0x20   : > { %p327_p2 = pnand %p326_p1, %p320_p12 }
  0x22   : > { %330 = shalt.err (!%p327_p2)
}
  0x23   : > { %s368_s12 = smov 128   ;;  %s369_s13 = smov 8  }
  0x24   : > { %263 = dma.hbm_to_vmem [thread:$0]  (!%p431_p8), %s427_s21, 256, %s429_s23, %s436_s25, %s368_s12, %s368_s12, %s369_s13  }
  0x25   : > { %p103_p11 = scmp.lt.s32.totalorder %s365_s9, 3  ;;  %p494_p13 = scmp.ge.s32.totalorder %s365_s9, 1 }
  0x27   : > { %p104_p3 = pnand %p494_p13, %p103_p11 }
  0x28   : > { %s109_s16 = sand.u32 (!%p104_p3), 1, %s357_s7  }
  0x29   : > { %107 = sbr.rel (%p104_p3) target bundleno = 179 (0xb3), region = 24  ;;  %s251_s17 = sshll.u32 (!%p104_p3), %s109_s16, 4 }
  0x2a   : > { %s110_s18 = scalar_lea.sflag (!%p104_p3), [#allocation3], %s109_s16  ;;  %s113_s19 = scalar_lea.vmem (!%p104_p3), [#allocation2], %s251_s17 }
  0x30   : > { %348 = dma.done.wait (%p418_p7), %s110_s18, 256  }
  0x31   : > { %350 = vsyncadd (%p418_p7), %s110_s18, 4294967040  ;;  %v137_v0 = vld [vmem:[%s113_s19 + $0x2] sm:$0xff]  ;;  %s370_s20 = smov 127   ;;  %v138_v5 = vld [vmem:[%s113_s19 + $0xa] sm:$0xf]  ;;  %s371_s9 = smov 126  }
  0x32   : > { %v151_v1 = vld [vmem:[%s113_s19] sm:$0xff]  ;;  %143 = vrot.lane.b32.xlu0 %v137_v0, %s370_s20  ;;  %v159_v4 = vmul.f32 -1.0, %v137_v0  ;;  %v152_v6 = vld [vmem:[%s113_s19 + $0x8] sm:$0xf]  ;;  %v160_v10 = vmul.f32 -1.0, %v138_v5  ;;  %p132_p7 = scmp.lt.s32.totalorder %s401_s10, 1 }
  0x33   : > { %v155_v2 = vld [vmem:[%s113_s19 + $0x1] sm:$0xff]  ;;  %v153_v3 = vmul.f32 -0.5, %v151_v1  ;;  %v154_v7 = vmul.f32 -0.5, %v152_v6  ;;  %v156_v8 = vld [vmem:[%s113_s19 + $0x9] sm:$0xf]  ;;  %v139_v14 = vmul.f32 -0.5, %v137_v0 }
  0x34   : > { %s500_s10 = smov (!%p132_p7, %s401_s10), 1  ;;  %v140_v17 = vmul.f32 -0.5, %v138_v5  ;;  %vm173_vm0 = vcmask 97280   ;;  %vm175_vm1 = vcmask 93184  }
  0x35   : > { %v157_v9 = vadd.f32 %v155_v2, %v153_v3  ;;  %v158_v11 = vadd.f32 %v156_v8, %v154_v7  ;;  %s257_s15 = sshll.u32 %s500_s10, 4 }
  0x36   : > { %145 = vrot.lane.b32.xlu0 %v138_v5, %s370_s20  ;;  %s136_s23 = scalar_lea.vmem %s491_s1, %s257_s15 }
  0x37   : > { %v161_v12 = vadd.f32 %v159_v4, %v157_v9  ;;  %v162_v13 = vadd.f32 %v160_v10, %v158_v11 }
  0x39   : > { %165 = vrot.lane.b32.xlu1 %v161_v12, %s371_s9 }
  0x3d   : > { %167 = vrot.lane.b32.xlu1 %v162_v13, %s371_s9 }
  0xa4   : > { %v144_v15 = vpop.permute.xlu0 %143 }
  0xa5   : > { %v149_v16 = vadd.f32 %v144_v15, %v139_v14 }
  0xa8   : > { %v146_v18 = vpop.permute.xlu0 %145 }
  0xa9   : > { %v150_v21 = vadd.f32 %v146_v18, %v140_v17 }
  0xab   : > { %v166_v19 = vpop.permute.xlu1 %165 }
  0xac   : > { %v171_v20 = vadd.f32 %v166_v19, %v149_v16 }
  0xae   : > { %174 = vst.msk [vmem:[%s136_s23] sm:$0xff] %vm173_vm0, %v171_v20 }
  0xaf   : > { %v168_v22 = vpop.permute.xlu1 %167 }
  0xb0   : > { %v172_v23 = vadd.f32 %v168_v22, %v150_v21 }
  0xb2   : > { %176 = vst.msk [vmem:[%s136_s23 + $0x8] sm:$0xf] %vm175_vm1, %v172_v23 }
  0xb3 PF: > { %p11_p8 = scmp.ge.s32.totalorder %s404_s11, 4   ;;  %s495_s6 = smov %s357_s7 }
  0xb4   : > { %s496_s7 = smov %s361_s8  ;;  %s497_s8 = smov %s414_s14 }
  0xb5   : > { %s498_s9 = smov %s404_s11  ;;  %13 = sbr.rel (!%p11_p8) target bundleno = 3 (0x3), region = 64 }
  0xbc   :  { %198 = vsyncpa [#allocation3], 1 }
  0xbd   :  { %200 = vsyncpa [#allocation3 + $0x1], 1 }

</bundles_post_ra>
